<compile_context>
chip_gen: v7x
topology: tpu7x:2x2x1
jax: 0.10.0
libtpu: 0.0.40
codegen_flags: <defaults>
</compile_context>

<pallas_src>
import math
from functools import partial

import jax
import jax.numpy as jnp
from jax import lax
from jax.experimental import pallas as pl
from jax.experimental.pallas import tpu as pltpu


# ----------------------------------------------------------------------------
# Linear kernels: x @ W (+ b), tiled over rows, weight resident per tile.
# ----------------------------------------------------------------------------
def _linear_bias_kernel(x_ref, w_ref, b_ref, o_ref):
    acc = jnp.dot(x_ref[...].astype(jnp.bfloat16),
                  w_ref[...].astype(jnp.bfloat16),
                  preferred_element_type=jnp.float32)
    o_ref[...] = (acc + b_ref[...]).astype(o_ref.dtype)


def _linear_nobias_kernel(x_ref, w_ref, o_ref):
    o_ref[...] = jnp.dot(x_ref[...].astype(jnp.bfloat16),
                         w_ref[...].astype(jnp.bfloat16),
                         preferred_element_type=jnp.float32).astype(o_ref.dtype)


def _pick_row_tile(M):
    # Largest exact divisor so every block is full (no reliance on edge masking).
    for t in (512, 256, 128, 64, 32, 16, 8, 4, 2, 1):
        if M % t == 0:
            return t
    return M


def _linear(x2d, w, b=None, out_dtype=jnp.float32):
    """x2d: (M, Cin); w: (Cin, Cout); b: (Cout,) or None -> (M, Cout)."""
    M, Cin = x2d.shape
    Cout = w.shape[1]
    tm = _pick_row_tile(M)
    grid = (M // tm,)
    x_spec = pl.BlockSpec((tm, Cin), lambda i: (i, 0))
    w_spec = pl.BlockSpec((Cin, Cout), lambda i: (0, 0))   # weight stays resident
    o_spec = pl.BlockSpec((tm, Cout), lambda i: (i, 0))
    cparams = pltpu.CompilerParams(dimension_semantics=("parallel",))
    out_shape = jax.ShapeDtypeStruct((M, Cout), out_dtype)
    if b is None:
        return pl.pallas_call(
            _linear_nobias_kernel, grid=grid,
            in_specs=[x_spec, w_spec], out_specs=o_spec, out_shape=out_shape,
            compiler_params=cparams,
        )(x2d, w)
    b_spec = pl.BlockSpec((1, Cout), lambda i: (0, 0))
    return pl.pallas_call(
        _linear_bias_kernel, grid=grid,
        in_specs=[x_spec, w_spec, b_spec], out_specs=o_spec, out_shape=out_shape,
        compiler_params=cparams,
    )(x2d, w, b.reshape(1, Cout))


# ----------------------------------------------------------------------------
# Attention core: per-batch block, static per-head loop, no (N,N) HBM writeback.
# ----------------------------------------------------------------------------
def _attn_kernel(qkv_ref, o_ref, *maybe_cls_ref, num_heads, scale, emit_cls):
    # qkv_ref: (1, N, 3C) bf16   o_ref: (1, N, C) f32   cls_ref: (1, 1, N) f32
    cls_ref = maybe_cls_ref[0] if emit_cls else None
    N, C = o_ref.shape[1], o_ref.shape[2]
    D = C // num_heads
    cls_acc = None
    # Static head loop -> all lane slices are compile-time constants.
    # TODO(synk): for D=64 on v6e/v7x, processing head-pairs (128-lane slices)
    # would keep the 256-wide MXU better fed; single-head slices kept for clarity.
    for h in range(num_heads):
        q = qkv_ref[0, :, h * D:(h + 1) * D].astype(jnp.bfloat16) * scale
        k = qkv_ref[0, :, C + h * D:C + (h + 1) * D].astype(jnp.bfloat16)
        v = qkv_ref[0, :, 2 * C + h * D:2 * C + (h + 1) * D].astype(jnp.bfloat16)
        # q @ k^T: contract last dims of both operands (k consumed untransposed).
        s = lax.dot_general(q, k, (((1,), (1,)), ((), ())),
                            preferred_element_type=jnp.float32)       # (N, N) f32
        m = jnp.max(s, axis=-1, keepdims=True)
        p = jnp.exp(s - m)                                            # unnormalized
        l = jnp.sum(p, axis=-1, keepdims=True)
        inv = pl.reciprocal(l, approx=True)                           # (N, 1), EUP
        o_h = jnp.dot(p.astype(jnp.bfloat16), v,
                      preferred_element_type=jnp.float32)             # (N, D) f32
        # Normalize the (N, D) output instead of the (N, N) probabilities.
        o_ref[0, :, h * D:(h + 1) * D] = (o_h * inv).astype(o_ref.dtype)
        if emit_cls:
            row = p[0:1, :] * inv[0:1, :]                             # cls softmax row
            cls_acc = row if cls_acc is None else cls_acc + row
    if emit_cls:
        cls_ref[0] = (cls_acc * (1.0 / num_heads)).astype(cls_ref.dtype)


def _attention_core(qkv3, num_heads, scale, emit_cls):
    """qkv3: (B, N, 3C) -> (out (B, N, C) f32, cls_mean (B, N) f32 or None)."""
    B, N, C3 = qkv3.shape
    C = C3 // 3
    kernel = partial(_attn_kernel, num_heads=num_heads, scale=scale,
                     emit_cls=emit_cls)
    in_specs = [pl.BlockSpec((1, N, C3), lambda b: (b, 0, 0))]
    out_spec = pl.BlockSpec((1, N, C), lambda b: (b, 0, 0))   # lane-dense output
    out_shape = jax.ShapeDtypeStruct((B, N, C), jnp.float32)
    # NOTE: for very large N / 64 MiB-VMEM parts, set vmem_limit_bytes and switch
    # to a KV-tiled (flash-style) inner loop; demo/ViT shapes fit the defaults.
    cparams = pltpu.CompilerParams(dimension_semantics=("parallel",))
    if emit_cls:
        cls_spec = pl.BlockSpec((1, 1, N), lambda b: (b, 0, 0))
        cls_shape = jax.ShapeDtypeStruct((B, 1, N), jnp.float32)
        out, cls = pl.pallas_call(
            kernel, grid=(B,), in_specs=in_specs,
            out_specs=(out_spec, cls_spec), out_shape=(out_shape, cls_shape),
            compiler_params=cparams,
        )(qkv3)
        return out, cls.reshape(B, N)
    out = pl.pallas_call(
        kernel, grid=(B,), in_specs=in_specs,
        out_specs=out_spec, out_shape=out_shape,
        compiler_params=cparams,
    )(qkv3)
    return out, None


# ----------------------------------------------------------------------------
# Module-equivalent forward
# ----------------------------------------------------------------------------
def attention_forward(x, params, *, num_heads, module_keep_rate=1.0,
                      keep_rate=None, distilled=False):
    """Equivalent of Attention.forward (attn_drop / proj_drop are 0.0 -> identity)."""
    if keep_rate is None:
        keep_rate = module_keep_rate
    B, N, C = x.shape
    D = C // num_heads
    scale = D ** (-0.5)

    # qkv projection; qkv_bias=False -> bias dropped entirely. Emit bf16: the
    # attention kernel consumes bf16 MXU operands anyway -> halves qkv HBM traffic.
    qkv = _linear(x.reshape(B * N, C), params["qkv_w"], params.get("qkv_b"),
                  out_dtype=jnp.bfloat16)
    qkv = qkv.reshape(B, N, 3 * C)          # free reshape — no HBM transpose

    need_cls = (module_keep_rate < 1) and (keep_rate < 1)
    out, cls_mean = _attention_core(qkv, num_heads, scale, need_cls)  # (B,N,C),(B,N)

    x_out = _linear(out.reshape(B * N, C), params["proj_w"], params["proj_b"])
    x_out = x_out.reshape(B, N, C)

    if need_cls:
        num_tokens_left = math.ceil(keep_rate * (N - 1))
        if num_tokens_left == N - 1:
            return x_out, None, None, None
        assert num_tokens_left >= 1
        start = 2 if distilled else 1
        # TODO(synk): top-k selection / gather has no clean Pallas TPU equivalent;
        # kept in plain JAX (operates on the tiny (B, N) cls row only).
        cls_attn = cls_mean[:, start:]                           # (B, N-start)
        _, idx = lax.top_k(cls_attn, num_tokens_left)            # sorted descending
        index = jnp.broadcast_to(idx[:, :, None], (B, num_tokens_left, C))
        non_topk_idx = idx[:, num_tokens_left:]                  # empty — mirrors PyTorch
        non_topk_index = jnp.broadcast_to(non_topk_idx[:, :, None], (B, 0, C))
        gathered = jnp.take_along_axis(cls_attn, non_topk_idx, axis=1)
        non_topk_attn = (jax.nn.softmax(gathered, axis=1)
                         if gathered.shape[1] > 0 else gathered)
        return x_out, index, non_topk_index, non_topk_attn

    return x_out, None, None, None


# ----------------------------------------------------------------------------
# Deterministic parameter init + pure-JAX reference + demo
# ----------------------------------------------------------------------------
def init_params(key, dim, qkv_bias=False):
    k1, k2, k3, k4 = jax.random.split(key, 4)
    s = 1.0 / math.sqrt(dim)
    return {
        # stored pre-transposed as (Cin, Cout) for x @ W
        "qkv_w": jax.random.uniform(k1, (dim, 3 * dim), jnp.float32, -s, s),
        "qkv_b": (jax.random.uniform(k4, (3 * dim,), jnp.float32, -s, s)
                  if qkv_bias else None),
        "proj_w": jax.random.uniform(k2, (dim, dim), jnp.float32, -s, s),
        "proj_b": jax.random.uniform(k3, (dim,), jnp.float32, -s, s),
    }


def _reference(x, params, num_heads):
    """Pure-JAX (f32) reference of the module forward (output x only)."""
    B, N, C = x.shape
    H, D = num_heads, C // num_heads
    qkv = x @ params["qkv_w"]
    if params.get("qkv_b") is not None:
        qkv = qkv + params["qkv_b"]
    qkv = qkv.reshape(B, N, 3, H, D).transpose(2, 0, 3, 1, 4)
    q, k, v = qkv[0], qkv[1], qkv[2]
    attn = jax.nn.softmax((q @ jnp.swapaxes(k, -2, -1)) * (D ** -0.5), axis=-1)
    out = (attn @ v).transpose(0, 2, 1, 3).reshape(B, N, C)
    return out @ params["proj_w"] + params["proj_b"]


if __name__ == "__main__":
    B, N, C, H = 2, 16, 32, 4   # small shapes: batch=2, seq=16, dim=32, 4 heads

    key = jax.random.PRNGKey(0)
    kx, kp = jax.random.split(key)
    x = jax.random.normal(kx, (B, N, C), dtype=jnp.float32)
    params = init_params(kp, C)

    ref = _reference(x, params, H)

    # Path 1: keep_rate == 1 — no attention matrix materialized at all.
    out, idx, nti, nta = attention_forward(x, params, num_heads=H,
                                           module_keep_rate=1.0)
    out = jax.block_until_ready(out)
    assert out.shape == (B, N, C)
    assert bool(jnp.allclose(out, ref, atol=3e-2, rtol=3e-2)), (
        f"mismatch vs reference, max abs err {float(jnp.max(jnp.abs(out - ref))):.4e}")
    assert idx is None and nti is None and nta is None

    # Path 2: token pruning — kernel additionally emits only the (B, N) cls row.
    keep = 0.5
    out2, index, non_topk_index, non_topk_attn = attention_forward(
        x, params, num_heads=H, module_keep_rate=keep)
    out2 = jax.block_until_ready(out2)
    k_left = math.ceil(keep * (N - 1))
    assert bool(jnp.allclose(out2, ref, atol=3e-2, rtol=3e-2))
    assert index.shape == (B, k_left, C)
    assert non_topk_index.shape == (B, 0, C)
    assert non_topk_attn.shape == (B, 0)
    sel = index[:, :, 0]
    assert bool(jnp.all((sel >= 0) & (sel < N - 1)))
    for b in range(B):
        assert len(set(sel[b].tolist())) == k_left   # unique token indices

    print("KERNEL_OK")
</pallas_src>

<mosaic_0001>
module attributes {stable_mosaic.version = 11 : i64} {
  func.func @_linear_nobias_kernel(%arg0: i32, %arg1: memref<32x32xf32, #tpu.memory_space<vmem>>, %arg2: memref<32x96xf32, #tpu.memory_space<vmem>>, %arg3: memref<32x96xbf16, #tpu.memory_space<vmem>>) attributes {dimension_semantics = [#tpu.dimension_semantics<parallel>], iteration_bounds = array<i64: 1>, scalar_prefetch = 0 : i64, scratch_operands = 0 : i64, tpu.core_type = #tpu.core_type<tc>, window_params = [{transform_indices = @transform_0, window_bounds = array<i64: 32, 32>}, {pipeline_mode = #tpu.pipeline_mode<synchronous>, transform_indices = @transform_1, window_bounds = array<i64: 32, 96>}, {transform_indices = @transform_2, window_bounds = array<i64: 32, 96>}]} {
    %c0 = arith.constant 0 : index
    %c0_0 = arith.constant 0 : index
    %0 = vector.load %arg1[%c0, %c0_0] : memref<32x32xf32, #tpu.memory_space<vmem>>, vector<32x32xf32>
    %1 = arith.truncf %0 : vector<32x32xf32> to vector<32x32xbf16>
    %c0_1 = arith.constant 0 : index
    %c0_2 = arith.constant 0 : index
    %2 = vector.load %arg2[%c0_1, %c0_2] : memref<32x96xf32, #tpu.memory_space<vmem>>, vector<32x96xf32>
    %3 = arith.truncf %2 : vector<32x96xf32> to vector<32x96xbf16>
    %cst = arith.constant dense<0.000000e+00> : vector<32x96xf32>
    %4 = tpu.matmul %1, %3, %cst {dimension_numbers = #tpu.dot_dimension_numbers<[1], [0], [0], [1], [0, 0, 1, 1], [], []>} : vector<32x32xbf16>, vector<32x96xbf16>, vector<32x96xf32> -> vector<32x96xf32>
    %5 = arith.truncf %4 : vector<32x96xf32> to vector<32x96xbf16>
    %c0_3 = arith.constant 0 : index
    %c0_4 = arith.constant 0 : index
    %6 = vector.load %arg3[%c0_3, %c0_4] : memref<32x96xbf16, #tpu.memory_space<vmem>>, vector<32x96xbf16>
    tpu.vector_store %arg3[%c0_3, %c0_4], %5 {strides = array<i32>} : memref<32x96xbf16, #tpu.memory_space<vmem>>, vector<32x96xbf16>,
    return
  }
  func.func @transform_0(%arg0: i32) -> (i32, i32) {
    %c0_i32 = arith.constant 0 : i32
    %c0_i32_0 = arith.constant 0 : i32
    return %arg0, %c0_i32 : i32, i32
  }
  func.func @transform_1(%arg0: i32) -> (i32, i32) {
    %c0_i32 = arith.constant 0 : i32
    %c0_i32_0 = arith.constant 0 : i32
    %c0_i32_1 = arith.constant 0 : i32
    return %c0_i32, %c0_i32_0 : i32, i32
  }
  func.func @transform_2(%arg0: i32) -> (i32, i32) {
    %c0_i32 = arith.constant 0 : i32
    %c0_i32_0 = arith.constant 0 : i32
    return %arg0, %c0_i32 : i32, i32
  }
}

</mosaic_0001>

<bundles_post_ra>
// kernel: tpu_custom_call.1
= control target key start
LH: loop header
LB: loop body
LE: loop exit
PB: predicated region body
PF: predicated region fallthrough
CT: control target
= control target key end

     0   :  { %7 = vsyncpa [#allocation3], 0  ;;  %s307_s0 = inlined_call_operand.hbm [shape: f32[32,32], index: 0, kind: input, shape index: {}]   ;;  %s308_s1 = inlined_call_operand.hbm [shape: f32[32,96], index: 1, kind: input, shape index: {}]   ;;  %s309_s2 = inlined_call_operand.hbm [shape: bf16[32,96], index: 2, kind: output, shape index: {}]  }
   0x1   :  { %8 = vsyncpa [#allocation6], 0 }
   0x2   :  { %9 = vsyncpa [#allocation4], 0  ;;  %s249_s9 = smov [#allocation2]   ;;  %s177_s13 = scalar_lea.hbm %s307_s0, 512 }
   0x3   :  { %s15_s10 = sshll.u32 %s249_s9, 4  ;;  %p178_p0 = scmp.ne.s32.totalorder %s307_s0, %s177_s13  ;;  %s16_s10 = int_to_ptr.vmem [resolvable:$true] %s15_s10 }
   0x4   :  { %p181_p1 = scmp.lt.u32.totalorder %s177_s13, %s307_s0 }
   0x6   :  { %p183_p2 = pnand %p181_p1, %p178_p0 }
   0x8   :  { %186 = shalt.err (!%p183_p2)
}
   0x9   :  { %s187_s18 = scalar_lea.vmem %s16_s10, 512  ;;  %p192_p4 = scmp.lt.s32.totalorder %s16_s10, %s16_s10 }
   0xa   :  { %p188_p3 = scmp.ne.s32.totalorder %s16_s10, %s187_s18  ;;  %p193_p5 = scmp.lt.s32.totalorder %s187_s18, %s187_s18 }
   0xc   :  { %p194_p6 = por %p193_p5, %p192_p4 }
   0xe   :  { %p195_p7 = pnand %p194_p6, %p188_p3 }
  0x10   :  { %198 = shalt.err (!%p195_p7)
}
  0x11   :  { %s250_s19 = smov 128   ;;  %s251_s20 = smov 8  }
  0x12   :  { %21 = dma.hbm_to_vmem [thread:$0]  %s307_s0, 512, %s16_s10, [#allocation3], %s250_s19, %s250_s19, %s251_s20  }
  0x13   :  { %s252_s23 = smov [#allocation5]   ;;  %s199_s27 = scalar_lea.hbm %s308_s1, 512 }
  0x14   :  { %s27_s24 = sshll.u32 %s252_s23, 4  ;;  %p200_p8 = scmp.ne.s32.totalorder %s308_s1, %s199_s27  ;;  %s28_s24 = int_to_ptr.vmem [resolvable:$true] %s27_s24 }
  0x15   :  { %p203_p9 = scmp.lt.u32.totalorder %s199_s27, %s308_s1 }
  0x17   :  { %p205_p10 = pnand %p203_p9, %p200_p8 }
  0x19   :  { %208 = shalt.err (!%p205_p10)
}
  0x1a   :  { %s209_s4 = scalar_lea.vmem %s28_s24, 512  ;;  %p214_p12 = scmp.lt.s32.totalorder %s28_s24, %s28_s24 }
  0x1b   :  { %p210_p11 = scmp.ne.s32.totalorder %s28_s24, %s209_s4  ;;  %p215_p13 = scmp.lt.s32.totalorder %s209_s4, %s209_s4 }
  0x1d   :  { %p216_p0 = por %p215_p13, %p214_p12 }
  0x1f   :  { %p217_p1 = pnand %p216_p0, %p210_p11 }
  0x21   :  { %220 = shalt.err (!%p217_p1)
}
  0x22   :  { %33 = dma.hbm_to_vmem [thread:$0]  %s308_s1, 512, %s28_s24, [#allocation6], %s250_s19, %s250_s19, %s251_s20  }
  0x23   :  { %243 = dma.done.wait [#allocation3], 512  }
  0x24   :  { %244 = vsyncadd [#allocation3], 4294966784 }
  0x25   :  { %245 = dma.done.wait [#allocation6], 512  }
  0x26   :  { %246 = vsyncadd [#allocation6], 4294966784  ;;  %v47_v0 = vld [vmem:[#allocation5] sm:$0xff]  ;;  %v48_v1 = vld [vmem:[#allocation5 + $0x8] sm:$0xff]  ;;  %vm53_vm0 = vcmask 261120   ;;  %vm125_vm1 = vcmask 781312  }
  0x27   :  { %v49_v2 = vld [vmem:[#allocation5 + $0x10] sm:$0xff]  ;;  %v51_v3 = vpack.c.bf16 %v48_v1, %v47_v0  ;;  %v50_v4 = vld [vmem:[#allocation5 + $0x18] sm:$0xff]  ;;  %v41_v5 = vld [vmem:[#allocation2] sm:$0xff]  ;;  %s253_s1 = smov [#allocation7]  }
  0x28   :  { %v42_v6 = vld [vmem:[#allocation2 + $0x8] sm:$0xff]  ;;  %v52_v7 = vpack.c.bf16 %v50_v4, %v49_v2  ;;  %v43_v9 = vld [vmem:[#allocation2 + $0x10] sm:$0xff]  ;;  %v44_v10 = vld [vmem:[#allocation2 + $0x18] sm:$0xff]  ;;  %s135_s6 = sshll.u32 %s253_s1, 4  ;;  %s136_s6 = int_to_ptr.vmem [resolvable:$true] %s135_s6 }
  0x29   :  { %v45_v8 = vpack.c.bf16 %v42_v6, %v41_v5  ;;  %162 = vmatprep.subr.bf16.mxu0 %v51_v3  ;;  %v46_v11 = vpack.c.bf16 %v44_v10, %v43_v9  ;;  %s221_s7 = scalar_lea.vmem %s136_s6, 256  ;;  %p226_p3 = scmp.lt.s32.totalorder %s136_s6, %s136_s6 }
  0x2a   :  { %163 = vmatpush3.bf16.msra.mxu0 %v51_v3  ;;  %p222_p2 = scmp.ne.s32.totalorder %s136_s6, %s221_s7  ;;  %p227_p4 = scmp.lt.s32.totalorder %s221_s7, %s221_s7 }
  0x2b   :  { %166 = vmatprep.mubr.msk.bf16.mxu0 %vm53_vm0, %v45_v8  ;;  %164 = vmatprep.subr.bf16.mxu0 %v52_v7 }
  0x2c   :  { %p228_p5 = por %p227_p4, %p226_p3 }
  0x2e   :  { %165 = vmatpush3.bf16.msra.mxu0 %v52_v7  ;;  %p229_p6 = pnand %p228_p5, %p222_p2 }
  0x31   :  { %167 = vmatmul.mubr.msk.bf16.vlgmr.msra.gmra.mrb[0].mxu0 %vm53_vm0, %v46_v11 }
 0x104   :  { %v168_v12 = vpop.f32.mrb[0].mxu0 }
 0x105   :  { %v156_v13 = vpack.c.bf16 %v168_v12, %v168_v12  ;;  %v94_v14 = vpop.f32.mrb[1].mxu0 }
 0x106   :  { %v154_v15 = vpack.c.bf16 %v94_v14, %v94_v14  ;;  %v169_v16 = vpop.f32.mrb[2].mxu0 }
 0x107   :  { %128 = vst.msk [vmem:[#allocation7 + $0x8] sm:$0xf] %vm125_vm1, %v156_v13  ;;  %v157_v17 = vpack.c.bf16 %v169_v16, %v169_v16  ;;  %v97_v18 = vpop.f32.mrb[3].mxu0 }
 0x108   :  { %126 = vst.msk [vmem:[#allocation7] sm:$0xf] %vm125_vm1, %v154_v15  ;;  %v155_v19 = vpack.c.bf16 %v97_v18, %v97_v18 }
 0x109   :  { %129 = vst.msk [vmem:[#allocation7 + $0xc] sm:$0xf] %vm125_vm1, %v157_v17 }
 0x10a   :  { %127 = vst.msk [vmem:[#allocation7 + $0x4] sm:$0xf] %vm125_vm1, %v155_v19 }
 0x10b   :  { %232 = shalt.err (!%p229_p6)
}
 0x10c   :  { %s233_s10 = scalar_lea.hbm %s309_s2, 256 }
 0x10d   :  { %p234_p7 = scmp.ne.s32.totalorder %s309_s2, %s233_s10  ;;  %p237_p8 = scmp.lt.u32.totalorder %s233_s10, %s309_s2 }
 0x10f   :  { %p239_p9 = pnand %p237_p8, %p234_p7 }
 0x111   :  { %242 = shalt.err (!%p239_p9)
}
 0x112   :  { %s254_s15 = smov 64   ;;  %s255_s16 = smov 4  }
 0x113   :  { %141 = dma.vmem_to_hbm [thread:$0]  %s136_s6, 256, %s309_s2, [#allocation4], %s254_s15, %s254_s15, %s255_s16  }
 0x114   :  { %247 = dma.done.wait [#allocation4], 256  }
 0x115   :  { %248 = vsyncadd [#allocation4], 4294967040 }
 0x116   :  { %145 = vsyncpa [#allocation3], 1 }
 0x117   :  { %146 = vsyncpa [#allocation6], 1 }
 0x118   :  { %147 = vsyncpa [#allocation4], 1 }

</bundles_post_ra>
